<compile_context>
chip_gen: v5e
topology: v5e:2x2
jax: 0.10.0
libtpu: 0.0.40
codegen_flags: <defaults>
</compile_context>

<pallas_src>
import functools

import jax
import jax.numpy as jnp
from jax.experimental import pallas as pl
from jax.experimental.pallas import tpu as pltpu

P_DROP = 0.5
SCALE = 1.0 / (1.0 - P_DROP)          # = 2.0 for p = 0.5

TARGET_TILE_ELEMS = 1 << 20           # ~4 MiB f32 / 2 MiB bf16 per data tile
MIN_SPLIT_BYTES = 2 << 20             # arrays >= 2 MiB always get >= 2 grid steps
_LANE_CHOICES = (2048, 1024, 512, 256, 128)
VMEM_LIMIT_BYTES = 32 * 1024 * 1024   # raise v5e's 16 MiB default; safe on all gens


def _round_up(x, m):
    return -(-x // m) * m


def _choose_2d(shape):
    """Pick a copy-free 2-D (rows, lanes) view of the flattened array."""
    n = 1
    for d in shape:
        n *= d
    for lanes in _LANE_CHOICES:       # lane-dense view, reshape is a bitcast
        if n % lanes == 0:
            return n // lanes, lanes
    if len(shape) >= 2:               # natural collapse, still copy-free
        return n // shape[-1], shape[-1]
    return 1, n


def _choose_tile_rows(rows, lanes, itemsize):
    total_bytes = rows * lanes * itemsize
    tr = max(8, (TARGET_TILE_ELEMS // max(lanes, 1)) // 8 * 8)
    tr = min(tr, rows)
    # Guarantee >= 2 grid steps on big arrays so v7x's two TCs both participate.
    if total_bytes >= MIN_SPLIT_BYTES and tr >= rows:
        tr = min(rows, _round_up(-(-rows // 2), 8))
    return tr


def _dropout_hw_kernel(seed_ref, x_ref, o_ref):
    """TPU path: hardware PRNG inside the kernel."""
    # Single folded int32 seed: independent stream per grid tile.
    pltpu.prng_seed(seed_ref[0] * pl.num_programs(0) + pl.program_id(0))
    bits = pltpu.prng_random_bits(x_ref.shape)
    # MSB == 0  <=>  keep with probability exactly 0.5 (sign-agnostic test).
    keep = (bits >> 31) == 0
    scale = jnp.asarray(SCALE, dtype=x_ref.dtype)   # stay in native dtype
    zero = jnp.asarray(0, dtype=x_ref.dtype)
    o_ref[...] = jnp.where(keep, x_ref[...] * scale, zero)


def _dropout_bits_kernel(x_ref, bits_ref, o_ref):
    """Portable path: random bits precomputed outside and streamed in."""
    keep = (bits_ref[...] >> 31) == 0
    scale = jnp.asarray(SCALE, dtype=x_ref.dtype)
    zero = jnp.asarray(0, dtype=x_ref.dtype)
    o_ref[...] = jnp.where(keep, x_ref[...] * scale, zero)


@functools.partial(jax.jit, static_argnames=("training",))
def my_model_forward(a, seed=0, *, training=True):
    """Equivalent of MyModel.forward (dropout p=0.5; identity in eval mode).

    Vary `seed` per training step to draw a fresh dropout mask each call.
    """
    if not training:
        return a                       # dropout is identity in eval mode

    orig_shape = a.shape
    n = a.size
    if n == 0:
        return a

    rows, lanes = _choose_2d(orig_shape)
    x2d = a.reshape(rows, lanes)       # layout-preserving view, no HBM copy
    tile_rows = _choose_tile_rows(rows, lanes, x2d.dtype.itemsize)
    grid = (pl.cdiv(rows, tile_rows),)              # ragged last block is masked
    blk = pl.BlockSpec((tile_rows, lanes), lambda i: (i, 0))
    out_shape = jax.ShapeDtypeStruct((rows, lanes), a.dtype)

    if jax.default_backend() == "tpu":
        seed_arr = jnp.asarray(seed, dtype=jnp.int32).reshape(1)
        out2d = pl.pallas_call(
            _dropout_hw_kernel,
            out_shape=out_shape,
            grid=grid,
            in_specs=[
                pl.BlockSpec(memory_space=pltpu.SMEM),  # seed scalar
                blk,                                    # data tiles
            ],
            out_specs=blk,
            compiler_params=pltpu.CompilerParams(
                dimension_semantics=("parallel",),      # shard grid over v7x TCs
                vmem_limit_bytes=VMEM_LIMIT_BYTES,
            ),
        )(seed_arr, x2d)
    else:
        # Non-TPU backend: TPU PRNG primitives unavailable; draw bits outside.
        key = jax.random.fold_in(jax.random.PRNGKey(0), jnp.asarray(seed, jnp.int32))
        bits = jax.random.bits(key, (rows, lanes), dtype=jnp.uint32)
        out2d = pl.pallas_call(
            _dropout_bits_kernel,
            out_shape=out_shape,
            grid=grid,
            in_specs=[blk, blk],
            out_specs=blk,
        )(x2d, bits)

    return out2d.reshape(orig_shape)


if __name__ == "__main__":
    key = jax.random.PRNGKey(0)
    x = jax.random.normal(key, (2, 4, 16, 16), dtype=jnp.float32)  # NCHW-style input

    y = jax.block_until_ready(my_model_forward(x, 0, training=True))

    # sanity: output elements are either 0 or 2*x (scale = 1/(1-0.5))
    assert y.shape == x.shape and y.dtype == x.dtype
    ok = jnp.logical_or(y == 0.0, jnp.isclose(y, 2.0 * x, rtol=1e-6, atol=1e-6))
    assert bool(jnp.all(ok)), "dropout semantics violated"

    # eval mode is identity
    y_eval = jax.block_until_ready(my_model_forward(x, training=False))
    assert bool(jnp.all(y_eval == x))

    print("KERNEL_OK")
</pallas_src>

<mosaic_0001>
module attributes {stable_mosaic.version = 11 : i64} {
  func.func @_dropout_bits_kernel(%arg0: i32, %arg1: memref<1x2048xf32, #tpu.memory_space<vmem>>, %arg2: memref<1x2048xi32, #tpu.memory_space<vmem>>, %arg3: memref<1x2048xf32, #tpu.memory_space<vmem>>) attributes {dimension_semantics = [#tpu.dimension_semantics<arbitrary>], iteration_bounds = array<i64: 1>, scalar_prefetch = 0 : i64, scratch_operands = 0 : i64, tpu.core_type = #tpu.core_type<tc>, window_params = [{transform_indices = @transform_0, window_bounds = array<i64: 1, 2048>}, {transform_indices = @transform_1, window_bounds = array<i64: 1, 2048>}, {transform_indices = @transform_2, window_bounds = array<i64: 1, 2048>}]} {
    %c0 = arith.constant 0 : index
    %c0_0 = arith.constant 0 : index
    %0 = vector.load %arg2[%c0, %c0_0] : memref<1x2048xi32, #tpu.memory_space<vmem>>, vector<1x2048xi32>
    %c31_i32 = arith.constant 31 : i32
    %1 = vector.broadcast %c31_i32 : i32 to vector<1x2048xi32>
    %2 = arith.shrui %0, %1 : vector<1x2048xi32>
    %c0_i32 = arith.constant 0 : i32
    %3 = vector.broadcast %c0_i32 : i32 to vector<1x2048xi32>
    %4 = arith.cmpi eq, %2, %3 : vector<1x2048xi32>
    %c0_1 = arith.constant 0 : index
    %c0_2 = arith.constant 0 : index
    %5 = vector.load %arg1[%c0_1, %c0_2] : memref<1x2048xf32, #tpu.memory_space<vmem>>, vector<1x2048xf32>
    %cst = arith.constant 2.000000e+00 : f32
    %6 = vector.broadcast %cst : f32 to vector<1x2048xf32>
    %7 = arith.mulf %5, %6 : vector<1x2048xf32>
    %cst_3 = arith.constant 0.000000e+00 : f32
    %8 = vector.broadcast %cst_3 : f32 to vector<1x2048xf32>
    %9 = arith.select %4, %7, %8 : vector<1x2048xi1>, vector<1x2048xf32>
    %c0_4 = arith.constant 0 : index
    %c0_5 = arith.constant 0 : index
    %10 = vector.load %arg3[%c0_4, %c0_5] : memref<1x2048xf32, #tpu.memory_space<vmem>>, vector<1x2048xf32>
    tpu.vector_store %arg3[%c0_4, %c0_5], %9 {strides = array<i32>} : memref<1x2048xf32, #tpu.memory_space<vmem>>, vector<1x2048xf32>,
    return
  }
  func.func @transform_0(%arg0: i32) -> (i32, i32) {
    %c0_i32 = arith.constant 0 : i32
    %c0_i32_0 = arith.constant 0 : i32
    return %arg0, %c0_i32 : i32, i32
  }
  func.func @transform_1(%arg0: i32) -> (i32, i32) {
    %c0_i32 = arith.constant 0 : i32
    %c0_i32_0 = arith.constant 0 : i32
    return %arg0, %c0_i32 : i32, i32
  }
  func.func @transform_2(%arg0: i32) -> (i32, i32) {
    %c0_i32 = arith.constant 0 : i32
    %c0_i32_0 = arith.constant 0 : i32
    return %arg0, %c0_i32 : i32, i32
  }
}

</mosaic_0001>

<bundles_post_ra>
// kernel: my_model_forward.3
= control target key start
LH: loop header
LB: loop body
LE: loop exit
PB: predicated region body
PF: predicated region fallthrough
CT: control target
= control target key end

     0   :  { %s62_s0 = inlined_call_operand.vmem [shape: f32[1,2048], index: 0, kind: input, shape index: {}]   ;;  %s63_s1 = inlined_call_operand.vmem [shape: u32[1,2048], index: 1, kind: input, shape index: {}]   ;;  %s64_s2 = inlined_call_operand.vmem [shape: f32[1,2048], index: 2, kind: output, shape index: {}]  }
   0x1   :  { %v11_v0 = vld [vmem:[%s63_s1] sm:$0xff]  ;;  %v12_v2 = vld [vmem:[%s63_s1 + $0x8] sm:$0xff] }
   0x2   :  { %v17_v1 = vld [vmem:[%s62_s0] sm:$0xff]  ;;  %v13_v3 = vshrl.u32 %v11_v0, 31  ;;  %v14_v5 = vshrl.u32 %v12_v2, 31  ;;  %v18_v6 = vld [vmem:[%s62_s0 + $0x8] sm:$0xff] }
   0x3   :  { %v19_v4 = vmul.f32 2.0, %v17_v1  ;;  %v20_v7 = vmul.f32 2.0, %v18_v6 }
   0x4   :  { %vm15_vm0 = vcmp.eq.s32.totalorder %v13_v3, 0  ;;  %vm16_vm1 = vcmp.eq.s32.totalorder %v14_v5, 0 }
   0x5   :  { %v21_v8 = vsel %vm15_vm0, %v19_v4, 0.0  ;;  %v22_v9 = vsel %vm16_vm1, %v20_v7, 0.0 }
   0x6   :  { %23 = vst [vmem:[%s64_s2] sm:$0xff] %v21_v8 }
   0x7   :  { %24 = vst [vmem:[%s64_s2 + $0x8] sm:$0xff] %v22_v9 }

</bundles_post_ra>
